<compile_context>
chip_gen: v7x
topology: tpu7x:2x2x1
jax: 0.10.0
libtpu: 0.0.40
codegen_flags: <defaults>
</compile_context>

<pallas_src>
import jax
import jax.numpy as jnp
from jax.experimental import pallas as pl
from jax.experimental.pallas import tpu as pltpu


def _maxpool2x2_kernel(x_ref, o_ref):
    """One grid step = a block of pooling bands.

    x_ref: (TR, 2*W)   row r = [image row 2i | image row 2i+1]  (lane-concat)
    o_ref: (TR, W//2)  pooled output rows
    """
    two_w = x_ref.shape[-1]
    w = two_w // 2
    w_out = o_ref.shape[-1]

    x = x_ref[...]
    # Vertical (H) pooling: the two image rows of each band are the two
    # contiguous lane halves of the block.
    hmax = jnp.maximum(x[:, :w], x[:, w:])            # (TR, W)

    # Horizontal (W) pooling: compact even / odd columns with exact 0/1
    # selection matmuls (one non-zero per column -> numerically exact), then
    # take the pairwise max.  This is pure lane compaction on the (otherwise
    # idle) MXU — no strided lane slicing, no per-column masked stores.
    rows = jax.lax.broadcasted_iota(jnp.int32, (w, w_out), 0)
    cols = jax.lax.broadcasted_iota(jnp.int32, (w, w_out), 1)
    sel_even = (rows == 2 * cols).astype(hmax.dtype)       # S[2j, j]   = 1
    sel_odd = (rows == 2 * cols + 1).astype(hmax.dtype)    # S[2j+1, j] = 1

    even = jnp.dot(hmax, sel_even, preferred_element_type=jnp.float32,
                   precision=jax.lax.Precision.HIGHEST)
    odd = jnp.dot(hmax, sel_odd, preferred_element_type=jnp.float32,
                  precision=jax.lax.Precision.HIGHEST)
    o_ref[...] = jnp.maximum(even, odd).astype(o_ref.dtype)


def _pick_row_block(rows, cap):
    """Largest divisor of `rows` that is <= cap, preferring full 8-row
    (sublane-aligned) blocks so the BlockSpec layout stays friendly."""
    cap = int(max(1, min(cap, rows)))
    best_any = 1
    best_mult8 = 0
    for d in range(cap, 0, -1):
        if rows % d == 0:
            if best_any == 1:
                best_any = d
            if d % 8 == 0:
                best_mult8 = d
                break
    if best_mult8:
        return best_mult8
    if best_any == rows:
        return best_any
    # Degenerate factorization: fall back to the full (always layout-legal)
    # extent; only happens for tiny/odd row counts.
    return rows


@jax.jit
def downsample(x):
    """MaxPool2d(kernel_size=2, stride=2, padding=0) on NCHW input."""
    n, c, h, w = x.shape
    assert h >= 2 and w >= 2, "MaxPool2d(2,2,0) needs H, W >= 2"
    h_out, w_out = h // 2, w // 2
    # PyTorch floors for odd H/W: drop the trailing row / column.
    if (h % 2) or (w % 2):
        x = x[:, :, : 2 * h_out, : 2 * w_out]
    w2 = 2 * w_out  # (even) input width actually pooled

    # Free, layout-preserving reshape (row-major):
    #   x2[r, 0:w2]   = image row 2i of (n, c)
    #   x2[r, w2:2w2] = image row 2i + 1 of (n, c)
    rows = n * c * h_out
    x2 = x.reshape(rows, 2 * w2)

    # ~2 MiB input blocks: near the HBM roofline, double-buffered working set
    # (2 in + 2 out blocks ~ 5 MiB) fits the default scoped VMEM on all gens.
    itemsize = jnp.dtype(x.dtype).itemsize
    target_in_bytes = 2 * 1024 * 1024
    cap = max(1, target_in_bytes // (2 * w2 * itemsize))
    if rows >= 2:
        cap = min(cap, rows // 2)   # keep >= 2 grid steps (v7x has 2 TCs)
    tr = _pick_row_block(rows, cap)

    out2 = pl.pallas_call(
        _maxpool2x2_kernel,
        out_shape=jax.ShapeDtypeStruct((rows, w_out), x.dtype),
        grid_spec=pltpu.PrefetchScalarGridSpec(
            num_scalar_prefetch=0,
            grid=(rows // tr,),
            in_specs=[pl.BlockSpec((tr, 2 * w2), lambda i: (i, 0))],
            out_specs=pl.BlockSpec((tr, w_out), lambda i: (i, 0)),
        ),
        compiler_params=pltpu.CompilerParams(
            dimension_semantics=("parallel",)),
    )(x2)

    # Free reshape back to NCHW output.
    return out2.reshape(n, c, h_out, w_out)


if __name__ == "__main__":
    key = jax.random.PRNGKey(0)
    x = jax.random.normal(key, (2, 4, 16, 16), dtype=jnp.float32)  # NCHW

    y = jax.block_until_ready(downsample(x))

    # pure-JAX reference for MaxPool2d(2, 2, 0) on NCHW
    ref = jnp.max(x.reshape(2, 4, 8, 2, 8, 2), axis=(3, 5))

    assert y.shape == (2, 4, 8, 8), y.shape
    assert y.dtype == x.dtype, y.dtype
    assert jnp.allclose(y, ref), "mismatch vs reference max-pool"
    print("KERNEL_OK")
</pallas_src>

<mosaic_0001>
module attributes {stable_mosaic.version = 11 : i64} {
  func.func @_maxpool2x2_kernel(%arg0: i32, %arg1: memref<32x32xf32, #tpu.memory_space<vmem>>, %arg2: memref<32x8xf32, #tpu.memory_space<vmem>>) attributes {dimension_semantics = [#tpu.dimension_semantics<parallel>], iteration_bounds = array<i64: 2>, scalar_prefetch = 0 : i64, scratch_operands = 0 : i64, tpu.core_type = #tpu.core_type<tc>, window_params = [{transform_indices = @transform_0, window_bounds = array<i64: 32, 32>}, {transform_indices = @transform_1, window_bounds = array<i64: 32, 8>}]} {
    %c0 = arith.constant 0 : index
    %c0_0 = arith.constant 0 : index
    %0 = vector.load %arg1[%c0, %c0_0] : memref<32x32xf32, #tpu.memory_space<vmem>>, vector<32x32xf32>
    %1 = vector.extract_strided_slice %0 {offsets = [0, 0], sizes = [32, 16], strides = [1, 1]} : vector<32x32xf32> to vector<32x16xf32>
    %2 = vector.extract_strided_slice %0 {offsets = [0, 16], sizes = [32, 16], strides = [1, 1]} : vector<32x32xf32> to vector<32x16xf32>
    %3 = arith.maximumf %1, %2 : vector<32x16xf32>
    %4 = tpu.iota {dimensions = array<i32: 0>} : vector<16x8xi32>
    %5 = tpu.iota {dimensions = array<i32: 1>} : vector<16x8xi32>
    %c2_i32 = arith.constant 2 : i32
    %6 = vector.broadcast %c2_i32 : i32 to vector<16x8xi32>
    %7 = arith.muli %6, %5 : vector<16x8xi32>
    %8 = arith.cmpi eq, %4, %7 : vector<16x8xi32>
    %9 = arith.extui %8 : vector<16x8xi1> to vector<16x8xi32>
    %10 = arith.sitofp %9 : vector<16x8xi32> to vector<16x8xf32>
    %c2_i32_1 = arith.constant 2 : i32
    %11 = vector.broadcast %c2_i32_1 : i32 to vector<16x8xi32>
    %12 = arith.muli %11, %5 : vector<16x8xi32>
    %c1_i32 = arith.constant 1 : i32
    %13 = vector.broadcast %c1_i32 : i32 to vector<16x8xi32>
    %14 = arith.addi %12, %13 : vector<16x8xi32>
    %15 = arith.cmpi eq, %4, %14 : vector<16x8xi32>
    %16 = arith.extui %15 : vector<16x8xi1> to vector<16x8xi32>
    %17 = arith.sitofp %16 : vector<16x8xi32> to vector<16x8xf32>
    %cst = arith.constant dense<0.000000e+00> : vector<32x8xf32>
    %18 = tpu.matmul %3, %10, %cst {dimension_numbers = #tpu.dot_dimension_numbers<[1], [0], [0], [1], [0, 0, 1, 1], [], []>, precision = #tpu.contract_precision<fp32>} : vector<32x16xf32>, vector<16x8xf32>, vector<32x8xf32> -> vector<32x8xf32>
    %cst_2 = arith.constant dense<0.000000e+00> : vector<32x8xf32>
    %19 = tpu.matmul %3, %17, %cst_2 {dimension_numbers = #tpu.dot_dimension_numbers<[1], [0], [0], [1], [0, 0, 1, 1], [], []>, precision = #tpu.contract_precision<fp32>} : vector<32x16xf32>, vector<16x8xf32>, vector<32x8xf32> -> vector<32x8xf32>
    %20 = arith.maximumf %18, %19 : vector<32x8xf32>
    %c0_3 = arith.constant 0 : index
    %c0_4 = arith.constant 0 : index
    %21 = vector.load %arg2[%c0_3, %c0_4] : memref<32x8xf32, #tpu.memory_space<vmem>>, vector<32x8xf32>
    tpu.vector_store %arg2[%c0_3, %c0_4], %20 {strides = array<i32>} : memref<32x8xf32, #tpu.memory_space<vmem>>, vector<32x8xf32>,
    return
  }
  func.func @transform_0(%arg0: i32) -> (i32, i32) {
    %c0_i32 = arith.constant 0 : i32
    %c0_i32_0 = arith.constant 0 : i32
    return %arg0, %c0_i32 : i32, i32
  }
  func.func @transform_1(%arg0: i32) -> (i32, i32) {
    %c0_i32 = arith.constant 0 : i32
    %c0_i32_0 = arith.constant 0 : i32
    return %arg0, %c0_i32 : i32, i32
  }
}

</mosaic_0001>

<bundles_post_ra>
// kernel: downsample.1
= control target key start
LH: loop header
LB: loop body
LE: loop exit
PB: predicated region body
PF: predicated region fallthrough
CT: control target
= control target key end

     0   :  { %6 = vsyncpa [#allocation3], 0  ;;  %s2066_s0 = inlined_call_operand.vmem [shape: f32[64,32], index: 0, kind: input, shape index: {}]   ;;  %s2067_s1 = inlined_call_operand.hbm [shape: f32[64,8], index: 1, kind: output, shape index: {}]  }
   0x1   :  { %8 = vsyncpa [#allocation3 + $0x1], 0  ;;  %s1868_s6 = smov 0   ;;  %s1870_s7 = smov 0  }
   0x2   :  { %s1872_s8 = smov 0   ;;  %s1874_s9 = smov 0  }
   0x3 LB: > { %s1889_s10 = sadd.s32 4294967295, %s1850_s9   ;;  %s1435_s11 = sadd.s32 4294967294, %s1850_s9   ;;  %s1850_s9 = sphi %s1874_s9, %s2077_s9   ;;  %s1846_s8 = sphi %s1872_s8, %s2076_s8   ;;  %s1842_s7 = sphi %s1870_s7, %s2075_s7   ;;  %s1838_s6 = sphi %s1868_s6, %s2074_s6  }
   0x4   : > { %s1893_s12 = sadd.s32 1, %s1850_s9   ;;  %s47_s13 = sadd.s32 1, %s1846_s8 }
   0x5   : > { %s44_s14 = ssub.s32 %s1850_s9, %s1893_s12  ;;  %p57_p0 = scmp.ne.s32.totalorder %s1846_s8, %s1842_s7 }
   0x6   : > { %p45_p1 = scmp.eq.s32.totalorder %s44_s14, 0  ;;  %p58_p2 = scmp.eq.s32.totalorder %s1889_s10, 1 }
   0x7   : > { %p63_p3 = scmp.ne.s32.totalorder %s1842_s7, %s1838_s6  ;;  %p64_p4 = scmp.eq.s32.totalorder %s1435_s11, 1 }
   0x8   : > { %s1904_s15 = scalar_select %p45_p1, %s1846_s8, %s47_s13  }
   0x9   : > { %p1906_p5 = por %p58_p2, %p57_p0  ;;  %p1910_p6 = por %p64_p4, %p63_p3 }
   0xa   : > { %p1438_p7 = scmp.ge.s32.totalorder %s1850_s9, 1  ;;  %p91_p8 = scmp.lt.s32.totalorder %s1850_s9, 3 }
   0xc   : > { %p92_p9 = pnand %p1438_p7, %p91_p8 }
   0xd   : > { %s1440_s18 = sshll.u32 (!%p92_p9), %s1889_s10, 2  ;;  %v142_v0 = vlaneseq (!%p92_p9)  ;;  %v1852_v8 = vmov (!%p92_p9), 0.0   ;;  %s1853_s23 = smov (!%p92_p9), 112   ;;  %v1854_v16 = vmov (!%p92_p9), 1.0|1.0   ;;  %vm161_vm6 = vcmask (!%p92_p9), 130048  }
   0xe   : > { %95 = sbr.rel (%p92_p9) target bundleno = 431 (0x1af), region = 24  ;;  %p112_p10 = scmp.lt.s32.totalorder (!%p92_p9), %s1440_s18, 7  ;;  %vm1354_vm7 = vcmask (!%p92_p9), 64512  }
   0xf   : > { %v143_v1 = vshrl.u32 (!%p92_p9), %v142_v0, 7  ;;  %v146_v2 = vand.u32 (!%p92_p9), 127, %v142_v0  ;;  %s108_s24 = sand.u32 (!%p92_p9), 1, %s1842_s7   ;;  %s1463_s28 = sshll.u32 (!%p92_p9), %s1889_s10, 9 }
  0x10   : > { %s1439_s25 = sshll.u32 (!%p92_p9), %s108_s24, 5  ;;  %s2021_s2 = scalar_lea.hbm (!%p92_p9), %s2067_s1, %s1463_s28 }
  0x11   : > { %v144_v3 = vadd.s32 (!%p92_p9), 8, %v143_v1  ;;  %v147_v4 = vmul.u32 (!%p92_p9), 2, %v146_v2  ;;  %s110_s26 = scalar_lea.vmem (!%p92_p9), [#allocation2], %s1439_s25  ;;  %s2025_s3 = scalar_lea.sflag (!%p92_p9), [#allocation3], %s108_s24 }
  0x12   : > { %s1373_s27 = sshll.u32 (!%p92_p9), %s110_s26, 4  ;;  %s1855_s5 = smov (!%p92_p9), [#allocation2]   ;;  %s2016_s27 = int_to_ptr.vmem [resolvable:$true] %s1373_s27 }
  0x13   : > { %vm148_vm0 = vcmp.eq.s32.totalorder (!%p92_p9), %v143_v1, %v147_v4  ;;  %vm149_vm1 = vcmp.eq.s32.totalorder (!%p92_p9), %v144_v3, %v147_v4  ;;  %v154_v5 = vadd.s32 (!%p92_p9), 1, %v147_v4  ;;  %s1788_s4 = scalar_lea.vmem (!%p92_p9), %s2016_s27, 512  ;;  %s1792_s10 = sshll.u32 (!%p92_p9), %s1855_s5, 4  ;;  %s1793_s10 = int_to_ptr.vmem [resolvable:$false] %s1792_s10 }
  0x14   : > { %v1442_v9 = vsel (!%p92_p9), %vm148_vm0, 1.0, %v1852_v8  ;;  %v1443_v10 = vsel (!%p92_p9), %vm149_vm1, 1.0, %v1852_v8  ;;  %vm1920_vm2 = vmpackc.low (!%p92_p9), %vm149_vm1, %vm148_vm0  ;;  %p1789_p11 = scmp.ne.s32.totalorder (!%p92_p9), %s2016_s27, %s1788_s4  ;;  %s1794_s11 = scalar_lea.vmem (!%p92_p9), %s1793_s10, 1024 }
  0x15   : > { %s2079_s18 = smov (!%p112_p10, %s1440_s18), 7  ;;  %v283_v12 = vsub.f32 %v1442_v9, %v1442_v9  ;;  %v290_v13 = vsub.f32 %v1443_v10, %v1443_v10  ;;  %vm155_vm3 = vcmp.eq.s32.totalorder %v143_v1, %v154_v5  ;;  %1657 = vmatprep.subr.msk.bf16.mxu0 %vm1920_vm2, %v1854_v16  ;;  %vm156_vm4 = vcmp.eq.s32.totalorder %v144_v3, %v154_v5  ;;  %p1795_p0 = scmp.lt.s32.totalorder %s2016_s27, %s1793_s10 }
  0x16   : > { %s1441_s19 = sshll.u32 %s2079_s18, 3  ;;  %v1444_v17 = vsel %vm155_vm3, 1.0, %v1852_v8  ;;  %v1445_v18 = vsel %vm156_vm4, 1.0, %v1852_v8  ;;  %vm1927_vm5 = vmpackc.low %vm156_vm4, %vm155_vm3  ;;  %1659 = vmatpush3.bf16.msk.msra.mxu0 %vm1920_vm2, %v1854_v16  ;;  %p1790_p12 = pnand %p1789_p11, %p1906_p5 }
  0x17   : > { %s115_s22 = scalar_lea.vmem %s2066_s0, %s1441_s19  ;;  %v871_v20 = vsub.f32 %v1444_v17, %v1444_v17  ;;  %v284_v21 = vand.u32 4294901760, %v283_v12  ;;  %v291_v22 = vand.u32 4294901760, %v290_v13  ;;  %1681 = vmatprep.subr.msk.bf16.mxu1 %vm1927_vm5, %v1854_v16  ;;  %v878_v23 = vsub.f32 %v1445_v18, %v1445_v18  ;;  %p1796_p1 = scmp.lt.s32.totalorder %s1794_s11, %s1788_s4 }
  0x18   : > { %v120_v6 = vld [vmem:[%s115_s22 + $0x10] sm:$0xff]  ;;  %v118_v7 = vld [vmem:[%s115_s22] sm:$0xff]  ;;  %v121_v14 = vld [vmem:[%s115_s22 + $0x18] sm:$0xff]  ;;  %1683 = vmatpush3.bf16.msk.msra.mxu1 %vm1927_vm5, %v1854_v16  ;;  %v1664_v35 = vpack.c.bf16 %v290_v13, %v283_v12  ;;  %p1791_p13 = pneg %p1790_p12 }
  0x19   : > { %130 = vrot.lane.b32.xlu1 %v120_v6, %s1853_s23  ;;  %126 = vrot.lane.b32.xlu0 %v118_v7, %s1853_s23  ;;  %v119_v15 = vld [vmem:[%s115_s22 + $0x8] sm:$0xff]  ;;  %v285_v24 = vsub.f32 %v283_v12, %v284_v21  ;;  %v292_v25 = vsub.f32 %v290_v13, %v291_v22  ;;  %v872_v26 = vand.u32 4294901760, %v871_v20  ;;  %v879_v27 = vand.u32 4294901760, %v878_v23  ;;  %p1797_p2 = por %p1796_p1, %p1795_p0 }
  0x1a   : > { %v1688_v36 = vpack.c.bf16 %v878_v23, %v871_v20  ;;  %v1940_v38 = vpack.c.bf16 %v291_v22, %v284_v21 }
  0x1b   : > { %v286_v28 = vand.u32 4294901760, %v285_v24  ;;  %v293_v29 = vand.u32 4294901760, %v292_v25  ;;  %v873_v30 = vsub.f32 %v871_v20, %v872_v26  ;;  %v880_v31 = vsub.f32 %v878_v23, %v879_v27  ;;  %p1798_p3 = pnand %p1797_p2, %p1791_p13 }
  0x1c   : > { %v1942_v39 = vpack.c.bf16 %v879_v27, %v872_v26 }
  0x1d   : > { %132 = vrot.lane.b32.xlu1 %v121_v14, %s1853_s23  ;;  %128 = vrot.lane.b32.xlu0 %v119_v15, %s1853_s23  ;;  %v1660_v32 = vpack.c.bf16 %v293_v29, %v286_v28  ;;  %v874_v33 = vand.u32 4294901760, %v873_v30  ;;  %v881_v34 = vand.u32 4294901760, %v880_v31 }
  0x1f   : > { %1661 = vmatprep.subr.bf16.mxu0 %v1660_v32  ;;  %v1684_v37 = vpack.c.bf16 %v881_v34, %v874_v33 }
  0x21   : > { %1685 = vmatprep.subr.bf16.mxu1 %v1684_v37 }
  0x8b   : > { %v131_v40 = vpop.permute.xlu1 %130  ;;  %v127_v41 = vpop.permute.xlu0 %126 }
  0x8c   : > { %v140_v42 = vmax.f32 %v120_v6, %v131_v40  ;;  %v138_v43 = vmax.f32 %v118_v7, %v127_v41 }
  0x8e   : > { %v169_v44 = vsel %vm161_vm6, %v140_v42, 0  ;;  %v163_v45 = vsel %vm161_vm6, %v138_v43, 0 }
  0x8f   : > { %v1946_v46 = vand.u32 4294901760, %v169_v44  ;;  %v1948_v47 = vand.u32 4294901760, %v163_v45  ;;  %v133_v48 = vpop.permute.xlu1 %132  ;;  %v129_v49 = vpop.permute.xlu0 %128 }
  0x90   : > { %v141_v50 = vmax.f32 %v121_v14, %v133_v48  ;;  %v139_v51 = vmax.f32 %v119_v15, %v129_v49 }
  0x91   : > { %v262_v52 = vsub.f32 %v169_v44, %v1946_v46  ;;  %v242_v53 = vsub.f32 %v163_v45, %v1948_v47 }
  0x92   : > { %v172_v54 = vsel %vm161_vm6, %v141_v50, 0  ;;  %v166_v55 = vsel %vm161_vm6, %v139_v51, 0 }
  0x93   : > { %v1954_v56 = vand.u32 4294901760, %v172_v54  ;;  %v1956_v57 = vand.u32 4294901760, %v166_v55  ;;  %v243_v58 = vand.u32 4294901760, %v242_v53  ;;  %v263_v62 = vand.u32 4294901760, %v262_v52 }
  0x95   : > { %v272_v59 = vsub.f32 %v172_v54, %v1954_v56  ;;  %v252_v60 = vsub.f32 %v166_v55, %v1956_v57  ;;  %v244_v61 = vsub.f32 %v242_v53, %v243_v58  ;;  %v264_v3 = vsub.f32 %v262_v52, %v263_v62 }
  0x97   : > { %v245_v63 = vand.u32 4294901760, %v244_v61  ;;  %v253_v0 = vand.u32 4294901760, %v252_v60  ;;  %v273_v1 = vand.u32 4294901760, %v272_v59  ;;  %v265_v6 = vand.u32 4294901760, %v264_v3 }
  0x99   : > { %1540 = vmatprep.mubr.f32.mxu0 %v245_v63  ;;  %1600 = vmatprep.mubr.f32.mxu1 %v245_v63  ;;  %v254_v2 = vsub.f32 %v252_v60, %v253_v0  ;;  %v274_v5 = vsub.f32 %v272_v59, %v273_v1 }
  0x9b   : > { %v255_v4 = vand.u32 4294901760, %v254_v2  ;;  %v275_v7 = vand.u32 4294901760, %v274_v5 }
  0x9d   : > { %1541 = vmatmul.mubr.f32.vlgmr.msra.gmra.mrb[0].mxu0 %v255_v4  ;;  %1601 = vmatmul.mubr.f32.vlgmr.msra.gmra.mrb[0].mxu1 %v255_v4 }
  0x9e   : > { %1663 = vmatpush3.bf16.msra.mxu0 %v1660_v32  ;;  %1687 = vmatpush3.bf16.msra.mxu1 %v1684_v37 }
  0x9f   : > { %1543 = vmatprep.mubr.f32.mxu0 %v265_v6  ;;  %1603 = vmatprep.mubr.f32.mxu1 %v265_v6 }
  0xa0   : > { %1665 = vmatprep.subr.bf16.mxu0 %v1664_v35  ;;  %1689 = vmatprep.subr.bf16.mxu1 %v1688_v36 }
  0xa1   : > { %1544 = vmatmul.mubr.f32.gmra.mrb[2].mxu0 %v275_v7  ;;  %1604 = vmatmul.mubr.f32.gmra.mrb[2].mxu1 %v275_v7 }
  0xa2   : > { %1550 = vmatprep.mubr.f32.mxu0 %v1948_v47  ;;  %1610 = vmatprep.mubr.f32.mxu1 %v1948_v47 }
  0xa5   : > { %1551 = vmatmul.mubr.f32.vlgmr.msra.gmra.mrb[0].mxu0 %v1956_v57  ;;  %1611 = vmatmul.mubr.f32.vlgmr.msra.gmra.mrb[0].mxu1 %v1956_v57 }
  0xa6   : > { %1667 = vmatpush3.bf16.msra.mxu0 %v1664_v35  ;;  %1691 = vmatpush3.bf16.msra.mxu1 %v1688_v36 }
  0xa7   : > { %1553 = vmatprep.mubr.f32.mxu0 %v1946_v46  ;;  %1613 = vmatprep.mubr.f32.mxu1 %v1946_v46 }
  0xa8   : > { %1669 = vmatprep.subr.msk.bf16.mxu0 %vm1920_vm2, %v1854_v16  ;;  %1693 = vmatprep.subr.msk.bf16.mxu1 %vm1927_vm5, %v1854_v16 }
  0xa9   : > { %1554 = vmatmul.mubr.f32.gmra.mrb[2].mxu0 %v1954_v56  ;;  %1614 = vmatmul.mubr.f32.gmra.mrb[2].mxu1 %v1954_v56 }
  0xaa   : > { %1560 = vmatprep.mubr.f32.mxu0 %v242_v53  ;;  %1620 = vmatprep.mubr.f32.mxu1 %v242_v53 }
  0xad   : > { %1561 = vmatmul.mubr.f32.vlgmr.msra.gmra.mrb[0].mxu0 %v252_v60  ;;  %1621 = vmatmul.mubr.f32.vlgmr.msra.gmra.mrb[0].mxu1 %v252_v60 }
  0xae   : > { %1671 = vmatpush3.bf16.msk.msra.mxu0 %vm1920_vm2, %v1854_v16  ;;  %1695 = vmatpush3.bf16.msk.msra.mxu1 %vm1927_vm5, %v1854_v16 }
  0xaf   : > { %1563 = vmatprep.mubr.f32.mxu0 %v262_v52  ;;  %1623 = vmatprep.mubr.f32.mxu1 %v262_v52 }
  0xb0   : > { %1673 = vmatprep.subr.bf16.mxu0 %v1940_v38  ;;  %1697 = vmatprep.subr.bf16.mxu1 %v1942_v39 }
  0xb1   : > { %1564 = vmatmul.mubr.f32.gmra.mrb[2].mxu0 %v272_v59  ;;  %1624 = vmatmul.mubr.f32.gmra.mrb[2].mxu1 %v272_v59 }
  0xb2   : > { %1570 = vmatprep.mubr.f32.mxu0 %v243_v58  ;;  %1630 = vmatprep.mubr.f32.mxu1 %v243_v58 }
  0xb5   : > { %1571 = vmatmul.mubr.f32.vlgmr.msra.gmra.mrb[0].mxu0 %v253_v0  ;;  %1631 = vmatmul.mubr.f32.vlgmr.msra.gmra.mrb[0].mxu1 %v253_v0 }
  0xb6   : > { %1675 = vmatpush3.bf16.msra.mxu0 %v1940_v38  ;;  %1699 = vmatpush3.bf16.msra.mxu1 %v1942_v39 }
  0xb7   : > { %1573 = vmatprep.mubr.f32.mxu0 %v263_v62  ;;  %1633 = vmatprep.mubr.f32.mxu1 %v263_v62 }
  0xb8   : > { %1677 = vmatprep.subr.msk.bf16.mxu0 %vm1920_vm2, %v1854_v16  ;;  %1701 = vmatprep.subr.msk.bf16.mxu1 %vm1927_vm5, %v1854_v16 }
  0xb9   : > { %1574 = vmatmul.mubr.f32.gmra.mrb[2].mxu0 %v273_v1  ;;  %1634 = vmatmul.mubr.f32.gmra.mrb[2].mxu1 %v273_v1 }
  0xba   : > { %1580 = vmatprep.mubr.f32.mxu0 %v1948_v47  ;;  %1640 = vmatprep.mubr.f32.mxu1 %v1948_v47 }
  0xbd   : > { %1581 = vmatmul.mubr.f32.vlgmr.msra.gmra.mrb[0].mxu0 %v1956_v57  ;;  %1641 = vmatmul.mubr.f32.vlgmr.msra.gmra.mrb[0].mxu1 %v1956_v57 }
  0xbe   : > { %1679 = vmatpush3.bf16.msk.msra.mxu0 %vm1920_vm2, %v1854_v16  ;;  %1703 = vmatpush3.bf16.msk.msra.mxu1 %vm1927_vm5, %v1854_v16 }
  0xbf   : > { %1583 = vmatprep.mubr.f32.mxu0 %v1946_v46  ;;  %1643 = vmatprep.mubr.f32.mxu1 %v1946_v46 }
  0xc1   : > { %1584 = vmatmul.mubr.f32.gmra.mrb[2].mxu0 %v1954_v56  ;;  %1644 = vmatmul.mubr.f32.gmra.mrb[2].mxu1 %v1954_v56 }
  0xc2   : > { %1590 = vmatprep.mubr.f32.mxu0 %v1948_v47  ;;  %1650 = vmatprep.mubr.f32.mxu1 %v1948_v47 }
  0xc5   : > { %1591 = vmatmul.mubr.f32.vlgmr.msra.gmra.mrb[0].mxu0 %v1956_v57  ;;  %1651 = vmatmul.mubr.f32.vlgmr.msra.gmra.mrb[0].mxu1 %v1956_v57 }
  0xc6   : > { %1593 = vmatprep.mubr.f32.mxu0 %v1946_v46  ;;  %1653 = vmatprep.mubr.f32.mxu1 %v1946_v46 }
  0xc9   : > { %1594 = vmatmul.mubr.f32.gmra.mrb[2].mxu0 %v1954_v56  ;;  %1654 = vmatmul.mubr.f32.gmra.mrb[2].mxu1 %v1954_v56 }
 0x198   : > { %v1592_v8 = vpop.f32.mrb[0].mxu0  ;;  %v1652_v9 = vpop.f32.mrb[0].mxu1 }
 0x199   : > { %v1351_v10 = vmax.f32 %v1592_v8, %v1652_v9  ;;  %v740_v11 = vpop.f32.mrb[1].mxu0  ;;  %v1328_v12 = vpop.f32.mrb[1].mxu1 }
 0x19a   : > { %v1350_v13 = vmax.f32 %v740_v11, %v1328_v12 }
 0x19b   : > { %1356 = vst.msk [vmem:[%s110_s26 + $0x8] sm:$0xff] %vm1354_vm7, %v1351_v10 }
 0x19c   : > { %1355 = vst.msk [vmem:[%s110_s26] sm:$0xff] %vm1354_vm7, %v1350_v13  ;;  %v1595_v14 = vpop.f32.mrb[2].mxu0  ;;  %v1655_v15 = vpop.f32.mrb[2].mxu1 }
 0x19d   : > { %v1353_v16 = vmax.f32 %v1595_v14, %v1655_v15  ;;  %v752_v17 = vpop.f32.mrb[3].mxu0  ;;  %v1340_v18 = vpop.f32.mrb[3].mxu1 }
 0x19e   : > { %v1352_v19 = vmax.f32 %v752_v17, %v1340_v18 }
 0x19f   : > { %1358 = vst.msk [vmem:[%s110_s26 + $0x18] sm:$0xff] %vm1354_vm7, %v1353_v16 }
 0x1a0   : > { %1357 = vst.msk [vmem:[%s110_s26 + $0x10] sm:$0xff] %vm1354_vm7, %v1352_v19 }
 0x1a1   : > { %1801 = shalt.err (!%p1798_p3)
}
 0x1a2   : > { %s1802_s13 = scalar_lea.hbm %s2021_s2, 512  ;;  %s1806_s19 = scalar_lea.hbm %s2067_s1, 1024 }
 0x1a3   : > { %p1803_p4 = scmp.ne.s32.totalorder %s2021_s2, %s1802_s13  ;;  %p1807_p9 = scmp.lt.u32.totalorder %s2021_s2, %s2067_s1 }
 0x1a4   : > { %p1808_p10 = scmp.lt.u32.totalorder %s1806_s19, %s1802_s13  ;;  %p1810_p12 = scmp.lt.u32.totalorder %s1802_s13, %s2021_s2 }
 0x1a5   : > { %p1804_p7 = pnand %p1803_p4, %p1906_p5 }
 0x1a6   : > { %p1809_p11 = por %p1808_p10, %p1807_p9 }
 0x1a7   : > { %p1805_p8 = pneg %p1804_p7 }
 0x1a8   : > { %p1811_p13 = por %p1810_p12, %p1809_p11 }
 0x1aa   : > { %p1812_p0 = pnand %p1811_p13, %p1805_p8 }
 0x1ac   : > { %1815 = shalt.err (!%p1812_p0)
}
 0x1ad   : > { %s1856_s22 = smov 128   ;;  %s1857_s23 = smov 8  }
 0x1ae   : > { %1744 = dma.vmem_to_hbm [thread:$0]  (%p1906_p5), %s2016_s27, 512, %s2021_s2, %s2025_s3, %s1856_s22, %s1856_s22, %s1857_s23  }
 0x1af PF: > { %p1750_p1 = scmp.ge.s32.totalorder %s1850_s9, 2  ;;  %s1388_s24 = sand.u32 1, %s1838_s6  }
 0x1b0   : > { %s1389_s25 = scalar_lea.sflag [#allocation3], %s1388_s24 }
 0x1b1   : > { %p1747_p2 = pnand %p1750_p1, %p1910_p6 }
 0x1b3   : > { %1833 = dma.done.wait (!%p1747_p2), %s1389_s25, 512  }
 0x1b4   : > { %1835 = vsyncadd (!%p1747_p2), %s1389_s25, 4294966784  ;;  %p11_p3 = scmp.ge.s32.totalorder %s1893_s12, 4   ;;  %s2074_s6 = smov %s1842_s7 }
 0x1b5   : > { %s2075_s7 = smov %s1846_s8  ;;  %s2076_s8 = smov %s1904_s15 }
 0x1b6   : > { %s2077_s9 = smov %s1893_s12  ;;  %13 = sbr.rel (!%p11_p3) target bundleno = 3 (0x3), region = 59 }
 0x1bd   :  { %1394 = vsyncpa [#allocation3], 1 }
 0x1be   :  { %1396 = vsyncpa [#allocation3 + $0x1], 1 }

</bundles_post_ra>
